<compile_context>
chip_gen: v7x
topology: tpu7x:2x2x1
jax: 0.10.0
libtpu: 0.0.40
codegen_flags: <defaults>
</compile_context>

<pallas_src>
import jax
import jax.numpy as jnp
from jax.experimental import pallas as pl
from jax.experimental.pallas import tpu as pltpu


def _round_up(x: int, m: int) -> int:
    return ((x + m - 1) // m) * m


def _frozen_bn_kernel(x_ref, scale_ref, shift_ref, o_ref):
    # x_ref:     (1, c_blk, hw_blk)  activation tile
    # scale_ref: (c_blk, 1)          per-channel scale (fp32)
    # shift_ref: (c_blk, 1)          per-channel shift (fp32)
    xv = x_ref[...].astype(jnp.float32)
    s = scale_ref[...][None, :, :]          # (1, c_blk, 1), broadcasts over lanes
    b = shift_ref[...][None, :, :]
    o_ref[...] = (xv * s + b).astype(o_ref.dtype)


def frozen_batchnorm2d(x, weight, bias, running_mean, running_var):
    """Pallas equivalent of FrozenBatchNorm2d.forward on an NCHW tensor."""
    N, C, H, W = x.shape
    assert weight.shape == (C,)

    # Fold frozen statistics into a per-channel affine, always in fp32.
    # (No eps: the reference module uses running_var.rsqrt() directly.)
    w32 = weight.astype(jnp.float32)
    b32 = bias.astype(jnp.float32)
    m32 = running_mean.astype(jnp.float32)
    v32 = running_var.astype(jnp.float32)
    scale = w32 * jax.lax.rsqrt(v32)          # (C,)
    shift = b32 - m32 * scale                 # (C,)

    HW = H * W
    itemsize = jnp.dtype(x.dtype).itemsize
    sublane = 8 if itemsize >= 4 else (16 if itemsize == 2 else 32)

    # Lane (last) block: multiple of 128, capped so an fp32 x-tile is ~2 MiB.
    hw_align = _round_up(HW, 128)
    hw_blk = min(hw_align, 2048)
    HWp = _round_up(HW, hw_blk)

    # Sublane (channel) block: multiple of the dtype's sublane packing.
    c_align = _round_up(C, sublane)
    c_blk = min(c_align, 256)
    Cp = _round_up(C, c_blk)

    x3 = x.reshape(N, C, HW)
    if Cp != C or HWp != HW:
        x3 = jnp.pad(x3, ((0, 0), (0, Cp - C), (0, HWp - HW)))
    scale_p = jnp.pad(scale, (0, Cp - C)).reshape(Cp, 1)
    shift_p = jnp.pad(shift, (0, Cp - C)).reshape(Cp, 1)

    grid = (N, Cp // c_blk, HWp // hw_blk)

    out = pl.pallas_call(
        _frozen_bn_kernel,
        out_shape=jax.ShapeDtypeStruct((N, Cp, HWp), x.dtype),
        grid_spec=pltpu.PrefetchScalarGridSpec(
            num_scalar_prefetch=0,
            grid=grid,
            in_specs=[
                pl.BlockSpec((1, c_blk, hw_blk), lambda n, ci, hi: (n, ci, hi)),
                pl.BlockSpec((c_blk, 1), lambda n, ci, hi: (ci, 0)),
                pl.BlockSpec((c_blk, 1), lambda n, ci, hi: (ci, 0)),
            ],
            out_specs=pl.BlockSpec(
                (1, c_blk, hw_blk), lambda n, ci, hi: (n, ci, hi)
            ),
        ),
        compiler_params=pltpu.CompilerParams(
            dimension_semantics=("parallel", "parallel", "parallel"),
        ),
    )(x3, scale_p, shift_p)

    return out[:, :C, :HW].reshape(N, C, H, W)


if __name__ == "__main__":
    key = jax.random.PRNGKey(0)
    N, C, H, W = 2, 4, 16, 16

    kx, kw, kb, km, kv = jax.random.split(key, 5)
    x = jax.random.normal(kx, (N, C, H, W), dtype=jnp.float32)

    # Deterministic "frozen" buffers (module __init__ shapes: all (C,)).
    weight = jnp.ones((C,), jnp.float32) + 0.1 * jax.random.normal(kw, (C,))
    bias = 0.1 * jax.random.normal(kb, (C,))
    running_mean = 0.1 * jax.random.normal(km, (C,))
    running_var = jnp.ones((C,), jnp.float32) + 0.1 * jnp.abs(
        jax.random.normal(kv, (C,))
    )

    out = frozen_batchnorm2d(x, weight, bias, running_mean, running_var)
    out = jax.block_until_ready(out)

    # Pure-JAX reference (mirrors the PyTorch forward exactly, no eps).
    scale_ref = (weight * jax.lax.rsqrt(running_var)).reshape(1, C, 1, 1)
    bias_ref = (
        bias - running_mean * weight * jax.lax.rsqrt(running_var)
    ).reshape(1, C, 1, 1)
    ref = x * scale_ref + bias_ref

    assert out.shape == (N, C, H, W)
    assert jnp.allclose(out, ref, atol=1e-5, rtol=1e-5)
    print("KERNEL_OK")
</pallas_src>

<mosaic_0001>
module attributes {stable_mosaic.version = 11 : i64} {
  func.func @_frozen_bn_kernel(%arg0: i32, %arg1: i32, %arg2: i32, %arg3: memref<1x8x256xf32, #tpu.memory_space<vmem>>, %arg4: memref<8x1xf32, #tpu.memory_space<vmem>>, %arg5: memref<8x1xf32, #tpu.memory_space<vmem>>, %arg6: memref<1x8x256xf32, #tpu.memory_space<vmem>>) attributes {dimension_semantics = [#tpu.dimension_semantics<parallel>, #tpu.dimension_semantics<parallel>, #tpu.dimension_semantics<parallel>], iteration_bounds = array<i64: 2, 1, 1>, scalar_prefetch = 0 : i64, scratch_operands = 0 : i64, tpu.core_type = #tpu.core_type<tc>, window_params = [{transform_indices = @transform_0, window_bounds = array<i64: 1, 8, 256>}, {transform_indices = @transform_1, window_bounds = array<i64: 8, 1>}, {transform_indices = @transform_2, window_bounds = array<i64: 8, 1>}, {transform_indices = @transform_3, window_bounds = array<i64: 1, 8, 256>}]} {
    %c0 = arith.constant 0 : index
    %c0_0 = arith.constant 0 : index
    %c0_1 = arith.constant 0 : index
    %0 = vector.load %arg3[%c0, %c0_0, %c0_1] : memref<1x8x256xf32, #tpu.memory_space<vmem>>, vector<1x8x256xf32>
    %c0_2 = arith.constant 0 : index
    %c0_3 = arith.constant 0 : index
    %1 = vector.load %arg4[%c0_2, %c0_3] : memref<8x1xf32, #tpu.memory_space<vmem>>, vector<8x1xf32>
    %2 = vector.shape_cast %1 : vector<8x1xf32> to vector<1x8x1xf32>
    %c0_4 = arith.constant 0 : index
    %c0_5 = arith.constant 0 : index
    %3 = vector.load %arg5[%c0_4, %c0_5] : memref<8x1xf32, #tpu.memory_space<vmem>>, vector<8x1xf32>
    %4 = vector.shape_cast %3 : vector<8x1xf32> to vector<1x8x1xf32>
    %5 = vector.broadcast %2 : vector<1x8x1xf32> to vector<1x8x256xf32>
    %6 = arith.mulf %0, %5 : vector<1x8x256xf32>
    %7 = vector.broadcast %4 : vector<1x8x1xf32> to vector<1x8x256xf32>
    %8 = arith.addf %6, %7 : vector<1x8x256xf32>
    %c0_6 = arith.constant 0 : index
    %c0_7 = arith.constant 0 : index
    %c0_8 = arith.constant 0 : index
    %9 = vector.load %arg6[%c0_6, %c0_7, %c0_8] : memref<1x8x256xf32, #tpu.memory_space<vmem>>, vector<1x8x256xf32>
    tpu.vector_store %arg6[%c0_6, %c0_7, %c0_8], %8 {strides = array<i32>} : memref<1x8x256xf32, #tpu.memory_space<vmem>>, vector<1x8x256xf32>,
    return
  }
  func.func @transform_0(%arg0: i32, %arg1: i32, %arg2: i32) -> (i32, i32, i32) {
    %c0_i32 = arith.constant 0 : i32
    return %arg0, %arg1, %arg2 : i32, i32, i32
  }
  func.func @transform_1(%arg0: i32, %arg1: i32, %arg2: i32) -> (i32, i32) {
    %c0_i32 = arith.constant 0 : i32
    %c0_i32_0 = arith.constant 0 : i32
    return %arg1, %c0_i32 : i32, i32
  }
  func.func @transform_2(%arg0: i32, %arg1: i32, %arg2: i32) -> (i32, i32) {
    %c0_i32 = arith.constant 0 : i32
    %c0_i32_0 = arith.constant 0 : i32
    return %arg1, %c0_i32 : i32, i32
  }
  func.func @transform_3(%arg0: i32, %arg1: i32, %arg2: i32) -> (i32, i32, i32) {
    %c0_i32 = arith.constant 0 : i32
    return %arg0, %arg1, %arg2 : i32, i32, i32
  }
}

</mosaic_0001>

<bundles_post_ra>
// kernel: tpu_custom_call.1
= control target key start
LH: loop header
LB: loop body
LE: loop exit
PB: predicated region body
PF: predicated region fallthrough
CT: control target
= control target key end

     0   :  { %8 = vsyncpa [#allocation3], 0  ;;  %s812_s0 = inlined_call_operand.hbm [shape: f32[2,8,256], index: 0, kind: input, shape index: {}]   ;;  %s813_s1 = inlined_call_operand.vmem [shape: f32[8,1], index: 1, kind: input, shape index: {}]   ;;  %s814_s2 = inlined_call_operand.vmem [shape: f32[8,1], index: 2, kind: input, shape index: {}]   ;;  %s815_s3 = inlined_call_operand.hbm [shape: f32[2,8,256], index: 3, kind: output, shape index: {}]  }
   0x1   :  { %10 = vsyncpa [#allocation3 + $0x1], 0 }
   0x2   :  { %11 = vsyncpa [#allocation4], 0 }
   0x3   :  { %13 = vsyncpa [#allocation4 + $0x1], 0  ;;  %s634_s12 = smov 0   ;;  %s636_s13 = smov 0  }
   0x4   :  { %s638_s14 = smov 0   ;;  %s640_s15 = smov 0  }
   0x5   :  { %s642_s16 = smov 0   ;;  %s644_s17 = smov 0  }
   0x6 LB: > { %s414_s18 = sadd.s32 4294967295, %s609_s17   ;;  %s415_s19 = sadd.s32 4294967294, %s609_s17   ;;  %s609_s17 = sphi %s644_s17, %s19_s17   ;;  %s605_s16 = sphi %s642_s16, %s831_s16   ;;  %s601_s15 = sphi %s640_s15, %s830_s15   ;;  %s597_s14 = sphi %s638_s14, %s829_s14   ;;  %s593_s13 = sphi %s636_s13, %s828_s13   ;;  %s589_s12 = sphi %s634_s12, %s827_s12  }
   0x7   : > { %s38_s20 = sadd.s32 1, %s605_s16  ;;  %s49_s21 = sadd.s32 1, %s597_s14 }
   0x8   : > { %p40_p0 = scmp.ge.s32.totalorder %s38_s20, 2  ;;  %p56_p1 = scmp.ne.s32.totalorder %s597_s14, %s593_s13 }
   0x9   : > { %p57_p2 = scmp.eq.s32.totalorder %s609_s17, 0  ;;  %p62_p3 = scmp.ne.s32.totalorder %s593_s13, %s589_s12 }
   0xa   : > { %s833_s20 = smov (%p40_p0, %s38_s20), 0  ;;  %p63_p5 = scmp.eq.s32.totalorder %s414_s18, 0 }
   0xb   : > { %p675_p4 = por %p57_p2, %p56_p1  ;;  %s42_s23 = ssub.s32 %s605_s16, %s833_s20 }
   0xc   : > { %p142_p6 = scmp.eq.s32.totalorder %s414_s18, 1  ;;  %p47_p7 = scmp.eq.s32.totalorder %s42_s23, 0 }
   0xd   : > { %p681_p8 = por %p63_p5, %p62_p3  ;;  %p148_p10 = scmp.eq.s32.totalorder %s415_s19, 1 }
   0xe   : > { %p685_p9 = por %p142_p6, %p56_p1  ;;  %p445_p13 = scmp.lt.s32.totalorder %s609_s17, 2 }
   0xf   : > { %s690_s26 = scalar_select %p47_p7, %s597_s14, %s49_s21  }
  0x10   : > { %s819_s25 = scalar_select %p685_p9, 1, 0 }
  0x11   : > { %p692_p11 = por %p148_p10, %p62_p3  ;;  %s182_s28 = sand.u32 1, %s597_s14  }
  0x12   : > { %s420_s29 = sshll.u32 %s182_s28, 4  ;;  %s431_s30 = sshll.u32 %s605_s16, 8 }
  0x13   : > { %s820_s27 = scalar_select %p692_p11, 1, 0 }
  0x14   : > { %s703_s6 = scalar_lea.hbm %s812_s0, %s431_s30  ;;  %s186_s7 = scalar_lea.vmem [#allocation2], %s420_s29 }
  0x15   : > { %s198_s8 = sshll.u32 %s186_s7, 4  ;;  %p709_p0 = pnand %p445_p13, %p675_p4  ;;  %s705_s8 = int_to_ptr.vmem [resolvable:$true] %s198_s8 }
  0x16   : > { %s183_s10 = scalar_lea.sflag [#allocation3], %s182_s28  ;;  %s497_s11 = scalar_lea.hbm %s703_s6, 256 }
  0x17   : > { %p498_p3 = scmp.ne.s32.totalorder %s703_s6, %s497_s11  ;;  %p499_p5 = pneg %p709_p0 }
  0x18   : > { %s502_s21 = scalar_lea.hbm %s812_s0, 512  ;;  %p503_p4 = scmp.lt.u32.totalorder %s703_s6, %s812_s0 }
  0x19   : > { %p500_p6 = pnand %p499_p5, %p498_p3  ;;  %p504_p10 = scmp.lt.u32.totalorder %s502_s21, %s497_s11 }
  0x1a   : > { %p506_p12 = scmp.lt.u32.totalorder %s497_s11, %s703_s6 }
  0x1b   : > { %p501_p7 = pneg %p500_p6  ;;  %p505_p13 = por %p504_p10, %p503_p4 }
  0x1d   : > { %p507_p1 = por %p506_p12, %p505_p13 }
  0x1f   : > { %p508_p2 = pnand %p507_p1, %p501_p7 }
  0x21   : > { %511 = shalt.err (!%p508_p2)
}
  0x22   : > { %s512_s28 = scalar_lea.vmem %s705_s8, 256  ;;  %s611_s29 = smov [#allocation2]  }
  0x23   : > { %p513_p3 = scmp.ne.s32.totalorder %s705_s8, %s512_s28  ;;  %s517_s30 = sshll.u32 %s611_s29, 4  ;;  %s518_s30 = int_to_ptr.vmem [resolvable:$false] %s517_s30 }
  0x24   : > { %s519_s4 = scalar_lea.vmem %s518_s30, 512  ;;  %p520_p9 = scmp.lt.s32.totalorder %s705_s8, %s518_s30 }
  0x25   : > { %p515_p6 = pnand %p513_p3, %p499_p5  ;;  %p521_p4 = scmp.lt.s32.totalorder %s519_s4, %s512_s28 }
  0x27   : > { %p516_p11 = pneg %p515_p6  ;;  %p522_p10 = por %p521_p4, %p520_p9 }
  0x29   : > { %p523_p12 = pnand %p522_p10, %p516_p11 }
  0x2b   : > { %526 = shalt.err (!%p523_p12)
}
  0x2c   : > { %440 = dma.hbm_to_vmem [thread:$0]  (!%p709_p0), %s703_s6, 256, %s705_s8, %s183_s10  }
  0x2d   : > { %p822_p1 = scmp.lt.s32.totalorder %s609_s17, 3  ;;  %p823_p2 = scmp.ge.s32.totalorder %s609_s17, 1 }
  0x2f   : > { %p204_p5 = pnand %p823_p2, %p822_p1 }
  0x30   : > { %s745_s5 = sand.u32 (!%p204_p5), 1, %s593_s13  }
  0x31   : > { %207 = sbr.rel (%p204_p5) target bundleno = 207 (0xcf), region = 32  ;;  %s424_s7 = sshll.u32 (!%p204_p5), %s745_s5, 4 }
  0x32   : > { %s210_s11 = scalar_lea.sflag (!%p204_p5), [#allocation3], %s745_s5  ;;  %s213_s18 = scalar_lea.vmem (!%p204_p5), [#allocation2], %s424_s7 }
  0x38   : > { %580 = dma.done.wait (%p681_p8), %s210_s11, 256  }
  0x39   : > { %582 = vsyncadd (%p681_p8), %s210_s11, 4294967040  ;;  %v612_v0 = vmov 0   ;;  %v256_v1 = vld [vmem:[%s813_s1] sm:$0xff]  ;;  %v255_v5 = vld [vmem:[%s213_s18 + $0x8] sm:$0xff]  ;;  %s432_s24 = sshll.u32 %s601_s15, 8  ;;  %s243_s19 = scalar_lea.vmem [#allocation5], %s424_s7 }
  0x3a   : > { %496 = vset.pattern.permute.xlu0 %v612_v0  ;;  %v257_v2 = vld [vmem:[%s814_s2] sm:$0xff]  ;;  %s293_s21 = sshll.u32 %s243_s19, 4  ;;  %s763_s28 = scalar_lea.hbm %s815_s3, %s432_s24  ;;  %s765_s21 = int_to_ptr.vmem [resolvable:$true] %s293_s21 }
  0x3b   : > { %260 = vperm.xlu0 %496, %v256_v1   ;;  %v254_v4 = vld [vmem:[%s213_s18] sm:$0xff]  ;;  %s275_s15 = scalar_lea.sflag [#allocation4], %s745_s5  ;;  %s527_s29 = scalar_lea.vmem %s765_s21, 256 }
  0x3c   : > { %p528_p8 = scmp.ne.s32.totalorder %s765_s21, %s527_s29  ;;  %p824_p9 = scmp.ne.s32.totalorder %s819_s25, 0 }
  0x3d   : > { %s613_s30 = smov [#allocation5]  }
  0x3e   : > { %p529_p11 = pnand %p528_p8, %p824_p9  ;;  %s531_s4 = sshll.u32 %s613_s30, 4  ;;  %s532_s4 = int_to_ptr.vmem [resolvable:$false] %s531_s4 }
  0x3f   : > { %267 = vperm.xlu0 %496, %v257_v2   ;;  %s533_s7 = scalar_lea.vmem %s532_s4, 512  ;;  %p534_p7 = scmp.lt.s32.totalorder %s765_s21, %s532_s4 }
  0x40   : > { %p530_p0 = pneg %p529_p11  ;;  %p535_p13 = scmp.lt.s32.totalorder %s533_s7, %s527_s29 }
  0x42   : > { %p536_p3 = por %p535_p13, %p534_p7 }
  0x44   : > { %p537_p6 = pnand %p536_p3, %p530_p0 }
  0xba   : > { %v261_v3 = vpop.permute.xlu0 %260 }
  0xbb   : > { %v263_v6 = vmul.f32 %v261_v3, %v254_v4  ;;  %v264_v7 = vmul.f32 %v261_v3, %v255_v5 }
  0xbe   : > { %v268_v8 = vpop.permute.xlu0 %267 }
  0xbf   : > { %v270_v9 = vadd.f32 %v268_v8, %v263_v6  ;;  %v271_v10 = vadd.f32 %v268_v8, %v264_v7 }
  0xc1   : > { %272 = vst [vmem:[%s243_s19] sm:$0xff] %v270_v9  ;;  %273 = vst [vmem:[%s243_s19 + $0x8] sm:$0xff] %v271_v10 }
  0xc2   : > { %540 = shalt.err (!%p537_p6)
}
  0xc3   : > { %s541_s5 = scalar_lea.hbm %s763_s28, 256  ;;  %s545_s6 = scalar_lea.hbm %s815_s3, 512 }
  0xc4   : > { %p542_p4 = scmp.ne.s32.totalorder %s763_s28, %s541_s5  ;;  %p546_p1 = scmp.lt.u32.totalorder %s763_s28, %s815_s3 }
  0xc5   : > { %p547_p2 = scmp.lt.u32.totalorder %s545_s6, %s541_s5  ;;  %p549_p8 = scmp.lt.u32.totalorder %s541_s5, %s763_s28 }
  0xc6   : > { %p543_p10 = pnand %p542_p4, %p824_p9 }
  0xc7   : > { %p548_p5 = por %p547_p2, %p546_p1 }
  0xc8   : > { %p544_p12 = pneg %p543_p10 }
  0xc9   : > { %p550_p11 = por %p549_p8, %p548_p5 }
  0xcb   : > { %p551_p0 = pnand %p550_p11, %p544_p12 }
  0xcd   : > { %554 = shalt.err (!%p551_p0)
}
  0xce   : > { %435 = dma.vmem_to_hbm [thread:$0]  (%p824_p9), %s765_s21, 256, %s763_s28, %s275_s15  }
  0xcf PF: > { %s305_s10 = sand.u32 1, %s589_s12   ;;  %p825_p7 = scmp.ne.s32.totalorder %s820_s27, 0 }
  0xd0   : > { %p826_p13 = scmp.ge.s32.totalorder %s609_s17, 2  ;;  %s306_s24 = scalar_lea.sflag [#allocation4], %s305_s10 }
  0xd2   : > { %p442_p3 = pnand %p826_p13, %p825_p7 }
  0xd4   : > { %584 = dma.done.wait (!%p442_p3), %s306_s24, 256  }
  0xd5   : > { %586 = vsyncadd (!%p442_p3), %s306_s24, 4294967040  ;;  %s19_s17 = sadd.s32 1, %s609_s17   ;;  %s827_s12 = smov %s593_s13 }
  0xd6   : > { %p16_p6 = scmp.ge.s32.totalorder %s19_s17, 4   ;;  %s828_s13 = smov %s597_s14 }
  0xd7   : > { %s829_s14 = smov %s690_s26  ;;  %s830_s15 = smov %s605_s16 }
  0xd8   : > { %s831_s16 = smov %s833_s20  ;;  %18 = sbr.rel (!%p16_p6) target bundleno = 6 (0x6), region = 83 }
  0xdf   :  { %311 = vsyncpa [#allocation3], 1 }
  0xe0   :  { %313 = vsyncpa [#allocation3 + $0x1], 1 }
  0xe1   :  { %314 = vsyncpa [#allocation4], 1 }
  0xe2   :  { %316 = vsyncpa [#allocation4 + $0x1], 1 }

</bundles_post_ra>
